<compile_context>
chip_gen: v7x
topology: tpu7x:2x2x1
jax: 0.10.0
libtpu: 0.0.40
codegen_flags: <defaults>
</compile_context>

<pallas_src>
from functools import partial

import jax
import jax.numpy as jnp
from jax import lax
from jax.experimental import pallas as pl
from jax.experimental.pallas import tpu as pltpu


_LANES = 128                                  # lane width of every block
_SUBLANES = 8
_UNIT = _SUBLANES * _LANES                    # minimal aligned tile: 1024 f32
_BLOCK_ELEMS_CAP = (2 * 1024 * 1024) // 4     # <= 2 MiB of f32 per block
_FUSED_MAX_ELEMS = 64 * 1024                  # tiny masks -> fused XLA path


def _tiling(height, width):
    """Static tiling of the flattened, padded H*W mask.

    The mask is viewed as (r_total, 128) lane-dense rows; one block is
    (rows_per_block, 128) flat elements (<= 2 MiB f32, rows_per_block a
    multiple of 8).  H*W is padded up to a whole number of blocks so there is
    never a full-slab fallback.
    """
    hw = height * width
    hw_units = -(-hw // _UNIT)                      # ceil(hw / 1024)
    cap_units = _BLOCK_ELEMS_CAP // _UNIT
    if hw_units >= 2:
        blk_units = min(cap_units, (hw_units + 1) // 2)   # >= 2 blocks/frame
    else:
        blk_units = 1
    total_blocks = -(-hw_units // blk_units)
    tile_elems = blk_units * _UNIT
    hw_pad = total_blocks * tile_elems
    rows_per_block = tile_elems // _LANES
    r_total = hw_pad // _LANES
    return tile_elems, hw_pad, rows_per_block, r_total, total_blocks


def _band_kernel(starts_ref, bounds_ref, *rest, width, lanes, pow2):
    """One (1, rows_per_block, 128) block of one batch element's flat mask.

    starts_ref: (B,)   int32 SMEM — clamped first block index of the y-band
    bounds_ref: (4B,)  int32 SMEM — [h_start, h_end, w_start, w_end] per batch
    prev_ref / out_ref: (1, RB, 128) f32 (aliased — in-place update)
    """
    if pow2:
        prev_ref, out_ref = rest
    else:
        x_idx_ref, prev_ref, out_ref = rest

    b = pl.program_id(0)
    j = pl.program_id(1)
    shape = out_ref.shape                       # (1, RB, LANES)
    tile = shape[1] * shape[2]
    base = (starts_ref[b] + j) * tile           # flat offset of this block

    hs = bounds_ref[4 * b + 0]
    he = bounds_ref[4 * b + 1]
    ws = bounds_ref[4 * b + 2]
    we = bounds_ref[4 * b + 3]

    row = lax.broadcasted_iota(jnp.int32, shape, 1)
    lane = lax.broadcasted_iota(jnp.int32, shape, 2)
    flat = base + row * lanes + lane            # flat index within H*W (padded)

    if pow2:
        x = flat & (width - 1)                  # column index = flat % W
    else:
        x = x_idx_ref[...]                      # precomputed flat % W pattern

    # torch quirk preserved: x (column) vs h-derived bounds,
    # y = flat // W (row) vs w-derived bounds expressed as a flat-range test.
    mask_x = (x >= hs) & (x <= he)
    mask_y = (flat >= ws * width) & (flat <= we * width + (width - 1))

    # self.mask[mask] = 1  ->  where(cond, 1, previous value), in place.
    out_ref[...] = jnp.where(mask_x & mask_y, jnp.float32(1.0), prev_ref[...])


@partial(jax.jit, static_argnames=("height", "width", "use_pallas"),
         donate_argnames=("prev",))
def kf_mask_update(motion, prev, *, height, width, use_pallas):
    """motion: (B, 2) f32; prev: (B, r_total, 128) f32 padded flat mask (donated)."""
    B = motion.shape[0]
    H, W = height, width
    tile_elems, hw_pad, rows_per_block, r_total, total_blocks = _tiling(H, W)
    assert prev.shape == (B, r_total, _LANES), (prev.shape, (B, r_total, _LANES))

    m0 = motion[:, 0]
    m1 = motion[:, 1]
    # torch.ceil(int + float).long(): ceil result is integer-valued, so a plain
    # int32 cast is exact (including negatives).
    h_start = jnp.ceil(H // 4 + m0).astype(jnp.int32)
    h_end = jnp.ceil(3 * H // 4 + m0).astype(jnp.int32)
    w_start = jnp.ceil(W // 4 + m1).astype(jnp.int32)
    w_end = jnp.ceil(3 * W // 4 + m1).astype(jnp.int32)

    if not use_pallas:
        # Tiny-mask guard: fused XLA elementwise is faster than a kernel launch.
        flat = jnp.arange(hw_pad, dtype=jnp.int32).reshape(1, r_total, _LANES)
        x = flat % W
        cond = ((x >= h_start[:, None, None]) & (x <= h_end[:, None, None]) &
                (flat >= (w_start * W)[:, None, None]) &
                (flat <= (w_end * W + (W - 1))[:, None, None]))
        return jnp.where(cond, jnp.float32(1.0), prev)

    # --- band-restricted Pallas path -------------------------------------
    # y-band: rows [w_start, w_end] — statically (3W//4 - W//4 + 1) rows.
    band_rows = 3 * W // 4 - W // 4 + 1
    band_elems = band_rows * W
    # Number of blocks needed to cover any placement of the band.
    nb = min(total_blocks, (band_elems - 1) // tile_elems + 2)

    # Clamp before use as a block offset: OOB DMA offsets have no runtime check.
    lo_row = jnp.clip(w_start, 0, H - 1)
    start_blk = jnp.clip((lo_row * W) // tile_elems, 0,
                         total_blocks - nb).astype(jnp.int32)

    bounds = jnp.stack([h_start, h_end, w_start, w_end], axis=1).reshape(-1)

    pow2 = (W & (W - 1)) == 0
    band_map = lambda b, j, st, bd: (b, st[b] + j, 0)

    in_specs = []
    args = [start_blk, bounds]
    if not pow2:
        # Fallback x (column) pattern for non-power-of-two W.
        x_idx = (jnp.arange(hw_pad, dtype=jnp.int32) % W).reshape(
            1, r_total, _LANES)
        in_specs.append(pl.BlockSpec((1, rows_per_block, _LANES),
                                     lambda b, j, st, bd: (0, st[b] + j, 0)))
        args.append(x_idx)
    in_specs.append(pl.BlockSpec((1, rows_per_block, _LANES), band_map))
    args.append(prev)
    prev_arg_idx = len(args) - 1   # alias index counts scalar-prefetch operands

    return pl.pallas_call(
        partial(_band_kernel, width=W, lanes=_LANES, pow2=pow2),
        out_shape=jax.ShapeDtypeStruct((B, r_total, _LANES), jnp.float32),
        grid_spec=pltpu.PrefetchScalarGridSpec(
            num_scalar_prefetch=2,
            grid=(B, nb),
            in_specs=in_specs,
            out_specs=pl.BlockSpec((1, rows_per_block, _LANES), band_map),
        ),
        input_output_aliases={prev_arg_idx: 0},       # in-place persistent mask
        compiler_params=pltpu.CompilerParams(
            dimension_semantics=("parallel", "arbitrary"),
            vmem_limit_bytes=32 * 1024 * 1024),
    )(*args)


def kf_mask_reference(motion, prev_mask, height, width):
    """Pure-JAX reference replicating the torch forward exactly.

    motion: (B, 2) f32; prev_mask: (B, H, W) f32 -> (B, H, W, 1) f32.
    """
    B = motion.shape[0]
    H, W = height, width
    h_start = jnp.ceil(H // 4 + motion[:, 0:1]).astype(jnp.int32)[..., None]
    h_end = jnp.ceil(3 * H // 4 + motion[:, 0:1]).astype(jnp.int32)[..., None]
    w_start = jnp.ceil(W // 4 + motion[:, 1:]).astype(jnp.int32)[..., None]
    w_end = jnp.ceil(3 * W // 4 + motion[:, 1:]).astype(jnp.int32)[..., None]
    x_range = jnp.broadcast_to(jnp.arange(W).reshape(1, 1, W), (B, H, W))
    y_range = jnp.broadcast_to(jnp.arange(H).reshape(1, H, 1), (B, H, W))
    mask_x = (x_range >= h_start) & (x_range <= h_end)
    mask_y = (y_range >= w_start) & (y_range <= w_end)
    cond = (mask_x & mask_y)[..., None]
    return jnp.where(cond, 1.0, prev_mask[..., None]).astype(jnp.float32)


class KfMaskPallas:
    """Mirrors the torch module: persistent zero-initialized mask buffer."""

    def __init__(self, batch, height, width, stride, force_pallas=False):
        self.B, self.H, self.W, self.S = batch, height, width, stride
        _, hw_pad, _, r_total, _ = _tiling(height, width)
        self._hw = height * width
        # Tiny-mask guard (review item 7): kernel only earns its keep on large frames.
        self._use_pallas = bool(force_pallas or
                                (batch * hw_pad > _FUSED_MAX_ELEMS))
        # torch: self.mask = torch.zeros(batch, H, W, 1).  Stored as a padded,
        # lane-dense (B, r_total, 128) view so the aliased/donated Pallas update
        # is fully in place; pad + channel are handled on return.
        self._buf = jnp.zeros((batch, r_total, _LANES), dtype=jnp.float32)

    def forward(self, motion):
        self._buf = kf_mask_update(motion, self._buf, height=self.H,
                                   width=self.W, use_pallas=self._use_pallas)
        flat = self._buf.reshape(self.B, -1)[:, : self._hw]
        return flat.reshape(self.B, self.H, self.W, 1)


if __name__ == "__main__":
    key = jax.random.PRNGKey(0)

    # --- small config (module-scale shapes): exercises both dispatch paths ---
    B, H, W, S = 2, 16, 16, 2
    mod_pallas = KfMaskPallas(B, H, W, S, force_pallas=True)   # Pallas kernel path
    mod_fused = KfMaskPallas(B, H, W, S)                       # tiny-mask fused path
    ref_state = jnp.zeros((B, H, W), dtype=jnp.float32)

    steps = []
    for _ in range(2):
        key, sub = jax.random.split(key)
        steps.append(jax.random.normal(sub, (B, 2), dtype=jnp.float32) * 3.0)
    # Deterministic out-of-frame motion: exercises clamping of the band offsets.
    steps.append(jnp.array([[-25.0, 40.0], [7.5, -30.0]], dtype=jnp.float32))

    for motion in steps:
        out_p = jax.block_until_ready(mod_pallas.forward(motion))
        out_f = jax.block_until_ready(mod_fused.forward(motion))
        ref = kf_mask_reference(motion, ref_state, H, W)
        ref_state = ref[..., 0]
        assert out_p.shape == (B, H, W, 1) and out_p.dtype == jnp.float32
        assert jnp.array_equal(out_p, ref), "Pallas (small) mismatch vs reference"
        assert jnp.array_equal(out_f, ref), "Fused (small) mismatch vs reference"

    # --- larger frame: the band update actually skips blocks (start > 0) and
    # untouched blocks must be preserved purely via the aliased buffer.
    B2, H2, W2 = 1, 4096, 1024
    mod_big = KfMaskPallas(B2, H2, W2, S)          # auto-selects the Pallas path
    ref2 = jnp.zeros((B2, H2, W2), dtype=jnp.float32)
    for motion in (jnp.array([[-5.0, 2000.0]], dtype=jnp.float32),
                   jnp.array([[-5.0, -100.0]], dtype=jnp.float32)):
        out = jax.block_until_ready(mod_big.forward(motion))
        refo = kf_mask_reference(motion, ref2, H2, W2)
        ref2 = refo[..., 0]
        assert jnp.array_equal(out, refo), "Pallas (large, band) mismatch vs reference"

    print("KERNEL_OK")
</pallas_src>

<mosaic_0001>
module attributes {stable_mosaic.version = 11 : i64} {
  func.func @_band_kernel(%arg0: i32, %arg1: i32, %arg2: memref<2xi32, #tpu.memory_space<smem>>, %arg3: memref<8xi32, #tpu.memory_space<smem>>, %arg4: memref<1x8x128xf32, #tpu.memory_space<vmem>>, %arg5: memref<1x8x128xf32, #tpu.memory_space<vmem>>) attributes {dimension_semantics = [#tpu.dimension_semantics<parallel>, #tpu.dimension_semantics<arbitrary>], iteration_bounds = array<i64: 2, 1>, scalar_prefetch = 2 : i64, scratch_operands = 0 : i64, tpu.core_type = #tpu.core_type<tc>, window_params = [{transform_indices = @transform_0, window_bounds = array<i64: 1, 8, 128>}, {transform_indices = @transform_1, window_bounds = array<i64: 1, 8, 128>}]} {
    %0 = arith.index_cast %arg0 : i32 to index
    %1 = memref.load %arg2[%0] : memref<2xi32, #tpu.memory_space<smem>>
    %2 = arith.addi %1, %arg1 : i32
    %c1024_i32 = arith.constant 1024 : i32
    %3 = arith.muli %2, %c1024_i32 : i32
    %c4_i32 = arith.constant 4 : i32
    %4 = arith.muli %c4_i32, %arg0 : i32
    %c0_i32 = arith.constant 0 : i32
    %5 = arith.addi %4, %c0_i32 : i32
    %6 = arith.index_cast %5 : i32 to index
    %7 = memref.load %arg3[%6] : memref<8xi32, #tpu.memory_space<smem>>
    %c4_i32_0 = arith.constant 4 : i32
    %8 = arith.muli %c4_i32_0, %arg0 : i32
    %c1_i32 = arith.constant 1 : i32
    %9 = arith.addi %8, %c1_i32 : i32
    %10 = arith.index_cast %9 : i32 to index
    %11 = memref.load %arg3[%10] : memref<8xi32, #tpu.memory_space<smem>>
    %c4_i32_1 = arith.constant 4 : i32
    %12 = arith.muli %c4_i32_1, %arg0 : i32
    %c2_i32 = arith.constant 2 : i32
    %13 = arith.addi %12, %c2_i32 : i32
    %14 = arith.index_cast %13 : i32 to index
    %15 = memref.load %arg3[%14] : memref<8xi32, #tpu.memory_space<smem>>
    %c4_i32_2 = arith.constant 4 : i32
    %16 = arith.muli %c4_i32_2, %arg0 : i32
    %c3_i32 = arith.constant 3 : i32
    %17 = arith.addi %16, %c3_i32 : i32
    %18 = arith.index_cast %17 : i32 to index
    %19 = memref.load %arg3[%18] : memref<8xi32, #tpu.memory_space<smem>>
    %20 = tpu.iota {dimensions = array<i32: 1>} : vector<1x8x128xi32>
    %21 = tpu.iota {dimensions = array<i32: 2>} : vector<1x8x128xi32>
    %c128_i32 = arith.constant 128 : i32
    %22 = vector.broadcast %c128_i32 : i32 to vector<1x8x128xi32>
    %23 = arith.muli %20, %22 : vector<1x8x128xi32>
    %24 = vector.broadcast %3 : i32 to vector<1x8x128xi32>
    %25 = arith.addi %24, %23 : vector<1x8x128xi32>
    %26 = arith.addi %25, %21 : vector<1x8x128xi32>
    %c15_i32 = arith.constant 15 : i32
    %27 = vector.broadcast %c15_i32 : i32 to vector<1x8x128xi32>
    %28 = arith.andi %26, %27 : vector<1x8x128xi32>
    %29 = vector.broadcast %7 : i32 to vector<1x8x128xi32>
    %30 = arith.cmpi sge, %28, %29 : vector<1x8x128xi32>
    %31 = vector.broadcast %11 : i32 to vector<1x8x128xi32>
    %32 = arith.cmpi sle, %28, %31 : vector<1x8x128xi32>
    %33 = arith.andi %30, %32 : vector<1x8x128xi1>
    %c16_i32 = arith.constant 16 : i32
    %34 = arith.muli %15, %c16_i32 : i32
    %35 = vector.broadcast %34 : i32 to vector<1x8x128xi32>
    %36 = arith.cmpi sge, %26, %35 : vector<1x8x128xi32>
    %c16_i32_3 = arith.constant 16 : i32
    %37 = arith.muli %19, %c16_i32_3 : i32
    %c15_i32_4 = arith.constant 15 : i32
    %38 = arith.addi %37, %c15_i32_4 : i32
    %39 = vector.broadcast %38 : i32 to vector<1x8x128xi32>
    %40 = arith.cmpi sle, %26, %39 : vector<1x8x128xi32>
    %41 = arith.andi %36, %40 : vector<1x8x128xi1>
    %42 = arith.andi %33, %41 : vector<1x8x128xi1>
    %c0 = arith.constant 0 : index
    %c0_5 = arith.constant 0 : index
    %c0_6 = arith.constant 0 : index
    %43 = vector.load %arg4[%c0, %c0_5, %c0_6] : memref<1x8x128xf32, #tpu.memory_space<vmem>>, vector<1x8x128xf32>
    %cst = arith.constant 1.000000e+00 : f32
    %44 = vector.broadcast %cst : f32 to vector<1x8x128xf32>
    %45 = arith.select %42, %44, %43 : vector<1x8x128xi1>, vector<1x8x128xf32>
    %c0_7 = arith.constant 0 : index
    %c0_8 = arith.constant 0 : index
    %c0_9 = arith.constant 0 : index
    %46 = vector.load %arg5[%c0_7, %c0_8, %c0_9] : memref<1x8x128xf32, #tpu.memory_space<vmem>>, vector<1x8x128xf32>
    tpu.vector_store %arg5[%c0_7, %c0_8, %c0_9], %45 {strides = array<i32>} : memref<1x8x128xf32, #tpu.memory_space<vmem>>, vector<1x8x128xf32>,
    return
  }
  func.func @transform_0(%arg0: i32, %arg1: i32, %arg2: memref<2xi32, #tpu.memory_space<smem>>, %arg3: memref<8xi32, #tpu.memory_space<smem>>) -> (i32, i32, i32) {
    %0 = arith.index_cast %arg0 : i32 to index
    %1 = memref.load %arg2[%0] : memref<2xi32, #tpu.memory_space<smem>>
    %2 = arith.addi %1, %arg1 : i32
    %c0_i32 = arith.constant 0 : i32
    %c0_i32_0 = arith.constant 0 : i32
    return %arg0, %2, %c0_i32 : i32, i32, i32
  }
  func.func @transform_1(%arg0: i32, %arg1: i32, %arg2: memref<2xi32, #tpu.memory_space<smem>>, %arg3: memref<8xi32, #tpu.memory_space<smem>>) -> (i32, i32, i32) {
    %0 = arith.index_cast %arg0 : i32 to index
    %1 = memref.load %arg2[%0] : memref<2xi32, #tpu.memory_space<smem>>
    %2 = arith.addi %1, %arg1 : i32
    %c0_i32 = arith.constant 0 : i32
    %c0_i32_0 = arith.constant 0 : i32
    return %arg0, %2, %c0_i32 : i32, i32, i32
  }
}

</mosaic_0001>

<bundles_post_ra>
// kernel: kf_mask_update.1
= control target key start
LH: loop header
LB: loop body
LE: loop exit
PB: predicated region body
PF: predicated region fallthrough
CT: control target
= control target key end

     0   :  { %s843_s0 = inlined_call_operand.vmem [shape: s32[2], index: 0, kind: input, shape index: {}]   ;;  %s844_s2 = inlined_call_operand.hbm [shape: f32[2,8,128], index: 2, kind: input, shape index: {}, may-alias: {2,3}]   ;;  %s845_s3 = inlined_call_operand.hbm [shape: f32[2,8,128], index: 3, kind: output, shape index: {}, may-alias: {2,3}]   ;;  %s846_s1 = inlined_call_operand.vmem [shape: s32[8], index: 1, kind: input, shape index: {}]  }
   0x1   :  { %s8_s14 = sshll.u32 %s843_s0, 4  ;;  %s12_s17 = sshll.u32 %s846_s1, 4  ;;  %s9_s14 = int_to_ptr.vmem [resolvable:$true] %s8_s14  ;;  %s13_s17 = int_to_ptr.vmem [resolvable:$true] %s12_s17 }
   0x2   :  { %s422_s18 = scalar_lea.vmem %s9_s14, 16  ;;  %p427_p1 = scmp.lt.s32.totalorder %s9_s14, %s9_s14 }
   0x3   :  { %p423_p0 = scmp.ne.s32.totalorder %s9_s14, %s422_s18  ;;  %p428_p2 = scmp.lt.s32.totalorder %s422_s18, %s422_s18 }
   0x5   :  { %p429_p3 = por %p428_p2, %p427_p1 }
   0x7   :  { %p430_p4 = pnand %p429_p3, %p423_p0 }
   0x9   :  { %433 = shalt.err (!%p430_p4)  }
   0xa   :  { %s586_s19 = smov [#allocation3]   ;;  %s434_s20 = scalar_lea.vmem %s13_s17, 16 }
   0xb   :  { %11 = dma.vmem_to_smem %s9_s14, 16, %s586_s19, [#allocation2] }
   0xc   :  { %p435_p5 = scmp.ne.s32.totalorder %s13_s17, %s434_s20  ;;  %p439_p6 = scmp.lt.s32.totalorder %s13_s17, %s13_s17 }
   0xd   :  { %p440_p7 = scmp.lt.s32.totalorder %s434_s20, %s434_s20 }
   0xf   :  { %p441_p8 = por %p440_p7, %p439_p6 }
  0x11   :  { %p442_p9 = pnand %p441_p8, %p435_p5 }
  0x13   :  { %445 = shalt.err (!%p442_p9)  }
  0x14   :  { %s587_s0 = smov [#allocation4]  }
  0x15   :  { %15 = dma.vmem_to_smem %s13_s17, 16, %s587_s0, [#allocation2] }
  0x16   :  { %540 = dma.done.wait [#allocation2], 32 }
  0x17   :  { %541 = vsyncadd [#allocation2], 4294967264 }
  0x18   :  { %17 = sfence }
  0x19   :  { %18 = vsyncpa [#allocation6], 0 }
  0x1a   :  { %20 = vsyncpa [#allocation6 + $0x1], 0 }
  0x1b   :  { %21 = vsyncpa [#allocation7], 0 }
  0x1c   :  { %23 = vsyncpa [#allocation7 + $0x1], 0  ;;  %s616_s1 = smov 0   ;;  %s618_s21 = smov 0  }
  0x1d   :  { %s620_s22 = smov 0   ;;  %s622_s23 = smov 0  }
  0x1e   :  { %s624_s24 = smov 0   ;;  %s626_s25 = smov 0  }
  0x1f   :  { %s628_s26 = smov 0   ;;  %s630_s27 = smov 0  }
  0x20   :  { %s632_s28 = smov 0  }
  0x21 LB: > { %s311_s29 = sadd.s32 4294967295, %s584_s28   ;;  %s312_s30 = sadd.s32 4294967294, %s584_s28   ;;  %s584_s28 = sphi %s632_s28, %s29_s28   ;;  %s580_s27 = sphi %s630_s27, %s867_s27   ;;  %s576_s26 = sphi %s628_s26, %s866_s26   ;;  %s572_s25 = sphi %s626_s25, %s865_s25   ;;  %s568_s24 = sphi %s624_s24, %s864_s24   ;;  %s564_s23 = sphi %s622_s23, %s863_s23   ;;  %s560_s22 = sphi %s620_s22, %s862_s22   ;;  %s556_s21 = sphi %s618_s21, %s861_s21   ;;  %s552_s1 = sphi %s616_s1, %s860_s1  }
  0x22   : > { %s41_s4 = sadd.s32 1, %s580_s27  ;;  %s45_s5 = sld [smem:[#allocation3 + %s580_s27]] }
  0x23   : > { %p43_p10 = scmp.ge.s32.totalorder %s41_s4, 2  ;;  %p61_p11 = scmp.ne.s32.totalorder %s572_s25, %s568_s24 }
  0x24   : > { %p62_p12 = scmp.eq.s32.totalorder %s584_s28, 0  ;;  %s54_s6 = sadd.s32 1, %s572_s25 }
  0x25   : > { %s869_s4 = smov (%p43_p10, %s41_s4), 0  ;;  %p67_p13 = scmp.ne.s32.totalorder %s568_s24, %s564_s23 }
  0x26   : > { %s47_s7 = sld [smem:[#allocation3 + %s869_s4]]  ;;  %p671_p0 = por %p62_p12, %p61_p11 }
  0x27   : > { %p68_p1 = scmp.eq.s32.totalorder %s311_s29, 0  ;;  %s77_s9 = sld [smem:[#allocation3 + %s580_s27]] }
  0x28   : > { %s49_s10 = ssub.s32 %s580_s27, %s869_s4  ;;  %s79_s11 = sld [smem:[#allocation3 + %s869_s4]] }
  0x29   : > { %p679_p2 = por %p68_p1, %p67_p13  ;;  %p96_p3 = scmp.ne.s32.totalorder %s560_s22, %s556_s21 }
  0x2a   : > { %p97_p4 = scmp.eq.s32.totalorder %s311_s29, 1  ;;  %p102_p5 = scmp.ne.s32.totalorder %s556_s21, %s552_s1 }
  0x2b   : > { %s850_s12 = scalar_select %p679_p2, 1, 0 }
  0x2c   : > { %p103_p6 = scmp.eq.s32.totalorder %s312_s30, 1  ;;  %s50_s13 = ssub.s32 %s45_s5, %s47_s7 }
  0x2d   : > { %p688_p8 = por %p97_p4, %p96_p3  ;;  %s51_s15 = sor.u32 %s50_s13, %s49_s10 }
  0x2e   : > { %p692_p9 = por %p103_p6, %p102_p5  ;;  %p52_p10 = scmp.eq.s32.totalorder %s51_s15, 0 }
  0x2f   : > { %s851_s14 = scalar_select %p688_p8, 1, 0 }
  0x30   : > { %s852_s16 = scalar_select %p692_p9, 1, 0 }
  0x31   : > { %s82_s17 = ssub.s32 %s77_s9, %s79_s11  ;;  %s86_s19 = sadd.s32 1, %s560_s22 }
  0x32   : > { %s83_s18 = sor.u32 %s82_s17, %s49_s10  ;;  %s123_s0 = sand.u32 1, %s572_s25  }
  0x33   : > { %s698_s20 = scalar_select %p52_p10, %s572_s25, %s54_s6  }
  0x34   : > { %p84_p11 = scmp.eq.s32.totalorder %s83_s18, 0  ;;  %p346_p12 = scmp.lt.s32.totalorder %s584_s28, 2 }
  0x35   : > { %s315_s29 = sshll.u32 %s123_s0, 3  ;;  %p317_p1 = scmp.ge.s32.totalorder %s584_s28, 1 }
  0x36   : > { %s703_s23 = scalar_select %p84_p11, %s560_s22, %s86_s19  }
  0x37   : > { %p707_p13 = pnand %p346_p12, %p671_p0  ;;  %p142_p3 = scmp.lt.s32.totalorder %s584_s28, 3 }
  0x38   : > { %s328_s5 = scalar_select %p671_p0, [#allocation3], [#allocation9] }
  0x39   : > { %s329_s7 = scalar_select %p671_p0, %s580_s27, 0 }
  0x3a   : > { %s871_s5 = smov (!%p346_p12, %s328_s5), [#allocation11]  ;;  %s127_s9 = scalar_lea.vmem [#allocation5], %s315_s29 }
  0x3b   : > { %s873_s7 = smov (!%p346_p12, %s329_s7), 0  ;;  %s137_s10 = sshll.u32 %s127_s9, 4  ;;  %s723_s10 = int_to_ptr.vmem [resolvable:$true] %s137_s10 }
  0x3c   : > { %s128_s6 = sld [smem:[%s871_s5 + %s873_s7]]  ;;  %p718_p4 = pnand %p317_p1, %p142_p3 }
  0x3d   : > { %s124_s19 = scalar_lea.sflag [#allocation6], %s123_s0  ;;  %p448_p5 = pneg %p707_p13 }
  0x42   : > { %s133_s13 = sadd.s32 %s580_s27, %s128_s6  ;;  %s451_s6 = scalar_lea.hbm %s844_s2, 256 }
  0x43   : > { %s316_s15 = sshll.u32 %s133_s13, 7 }
  0x44   : > { %s728_s18 = scalar_lea.hbm %s844_s2, %s316_s15 }
  0x45   : > { %s446_s29 = scalar_lea.hbm %s728_s18, 128  ;;  %p452_p11 = scmp.lt.u32.totalorder %s728_s18, %s844_s2 }
  0x46   : > { %p447_p0 = scmp.ne.s32.totalorder %s728_s18, %s446_s29  ;;  %p453_p12 = scmp.lt.u32.totalorder %s451_s6, %s446_s29 }
  0x47   : > { %p455_p3 = scmp.lt.u32.totalorder %s446_s29, %s728_s18 }
  0x48   : > { %p449_p6 = pnand %p448_p5, %p447_p0  ;;  %p454_p1 = por %p453_p12, %p452_p11 }
  0x4a   : > { %p450_p10 = pneg %p449_p6  ;;  %p456_p7 = por %p455_p3, %p454_p1 }
  0x4c   : > { %p457_p9 = pnand %p456_p7, %p450_p10 }
  0x4e   : > { %460 = shalt.err (!%p457_p9)
}
  0x4f   : > { %s461_s0 = scalar_lea.vmem %s723_s10, 128  ;;  %s588_s15 = smov [#allocation5]  }
  0x50   : > { %p462_p0 = scmp.ne.s32.totalorder %s723_s10, %s461_s0  ;;  %s466_s17 = sshll.u32 %s588_s15, 4  ;;  %s467_s17 = int_to_ptr.vmem [resolvable:$false] %s466_s17 }
  0x51   : > { %s468_s8 = scalar_lea.vmem %s467_s17, 256  ;;  %p469_p2 = scmp.lt.s32.totalorder %s723_s10, %s467_s17 }
  0x52   : > { %p464_p6 = pnand %p462_p0, %p448_p5  ;;  %p470_p11 = scmp.lt.s32.totalorder %s468_s8, %s461_s0 }
  0x54   : > { %p465_p8 = pneg %p464_p6  ;;  %p471_p12 = por %p470_p11, %p469_p2 }
  0x56   : > { %p472_p1 = pnand %p471_p12, %p465_p8 }
  0x58   : > { %475 = shalt.err (!%p472_p1)
}
  0x59   : > { %341 = dma.hbm_to_vmem [thread:$0]  (!%p707_p13), %s728_s18, 128, %s723_s10, %s124_s19  }
  0x5a   : > { %146 = sbr.rel (%p718_p4) target bundleno = 137 (0x89), region = 24  ;;  %s148_s29 = sand.u32 (!%p718_p4), 1, %s568_s24  }
  0x5b   : > { %s758_s5 = sshll.u32 (!%p718_p4), %s148_s29, 3  ;;  %s149_s7 = scalar_lea.sflag (!%p718_p4), [#allocation6], %s148_s29 }
  0x5c   : > { %p855_p7 = scmp.ne.s32.totalorder (!%p718_p4), %s850_s12, 0 }
  0x61   : > { %543 = dma.done.wait (%p855_p7), %s149_s7, 128  }
  0x62   : > { %545 = vsyncadd (%p855_p7), %s149_s7, 4294967168  ;;  %s321_s30 = sshll.u32 %s576_s26, 2  ;;  %v186_v0 = vlaneseq  ;;  %s175_s10 = sld [smem:[#allocation3 + %s576_s26]] }
  0x63   : > { %s168_s11 = sand.u32 1, %s556_s21   ;;  %s179_s18 = sld [smem:[#allocation4 + %s321_s30]] }
  0x64   : > { %v187_v1 = vshrl.u32 %v186_v0, 7  ;;  %s180_s19 = sadd.s32 1, %s321_s30  ;;  %s182_s9 = sadd.s32 2, %s321_s30  ;;  %v189_v3 = vand.u32 127, %v186_v0 }
  0x65   : > { %s181_s13 = sld [smem:[#allocation4 + %s180_s19]]  ;;  %s184_s15 = sadd.s32 3, %s321_s30 }
  0x66   : > { %s183_s0 = sld [smem:[#allocation4 + %s182_s9]]  ;;  %v190_v2 = vmul.u32 128, %v187_v1  ;;  %s770_s17 = sshll.u32 %s168_s11, 3 }
  0x67   : > { %s185_s12 = sld [smem:[#allocation4 + %s184_s15]]  ;;  %p856_p2 = scmp.ne.s32.totalorder %s851_s14, 0 }
  0x68   : > { %s320_s8 = sshll.u32 %s175_s10, 10  ;;  %s170_s10 = scalar_lea.vmem [#allocation8], %s770_s17 }
  0x69   : > { %v191_v4 = vstv %s320_s8  ;;  %s332_s29 = scalar_select %p856_p2, [#allocation3], [#allocation10]  ;;  %v195_v8 = vstv %s179_s18 }
  0x6a   : > { %v192_v5 = vadd.s32 %v191_v4, %v190_v2  ;;  %s333_s7 = scalar_select %p856_p2, %s576_s26, 0 }
  0x6b   : > { %v197_v9 = vstv %s181_s13  ;;  %s229_s15 = sshll.u32 %s170_s10, 4  ;;  %s213_s17 = scalar_lea.sflag [#allocation7], %s168_s11  ;;  %s781_s15 = int_to_ptr.vmem [resolvable:$true] %s229_s15 }
  0x6c   : > { %s322_s6 = sshll.u32 %s183_s0, 4  ;;  %v193_v6 = vadd.s32 %v192_v5, %v189_v3  ;;  %s220_s19 = sld [smem:[%s332_s29 + %s333_s7]] }
  0x6d   : > { %v201_v7 = vstv %s322_s6  ;;  %s323_s30 = sshll.u32 %s185_s12, 4  ;;  %s857_s0 = scalar_lea.vmem [#allocation5], %s758_s5 }
  0x6e   : > { %v194_v10 = vand.u32 15, %v193_v6  ;;  %s204_s9 = sadd.s32 15, %s323_s30  ;;  %vm202_vm0 = vcmp.ge.s32.totalorder %v193_v6, %v201_v7  ;;  %v209_v12 = vld [vmem:[%s857_s0] sm:$0xff]  ;;  %s476_s5 = scalar_lea.vmem %s781_s15, 128 }
  0x6f   : > { %v205_v11 = vstv %s204_s9  ;;  %p477_p8 = scmp.ne.s32.totalorder %s781_s15, %s476_s5 }
  0x70   : > { %vm196_vm1 = vcmp.ge.s32.totalorder %v194_v10, %v195_v8  ;;  %vm198_vm2 = vcmp.le.s32.totalorder %v194_v10, %v197_v9  ;;  %vm206_vm3 = vcmp.le.s32.totalorder %v193_v6, %v205_v11 }
  0x71   : > { %vm199_vm4 = vmand %vm196_vm1, %vm198_vm2  ;;  %p478_p9 = pnand %p477_p8, %p856_p2 }
  0x72   : > { %vm207_vm5 = vmand %vm202_vm0, %vm206_vm3  ;;  %s225_s6 = sadd.s32 %s576_s26, %s220_s19  ;;  %s589_s26 = smov [#allocation8]  }
  0x73   : > { %vm208_vm6 = vmand %vm199_vm4, %vm207_vm5  ;;  %s325_s18 = sshll.u32 %s225_s6, 7  ;;  %p479_p13 = pneg %p478_p9 }
  0x74   : > { %v210_v13 = vsel %vm208_vm6, 1.0, %v209_v12  ;;  %s786_s8 = scalar_lea.hbm %s845_s3, %s325_s18  ;;  %s480_s29 = sshll.u32 %s589_s26, 4  ;;  %s481_s29 = int_to_ptr.vmem [resolvable:$false] %s480_s29 }
  0x75   : > { %211 = vst [vmem:[%s170_s10] sm:$0xff] %v210_v13  ;;  %s482_s7 = scalar_lea.vmem %s481_s29, 256  ;;  %p483_p4 = scmp.lt.s32.totalorder %s781_s15, %s481_s29 }
  0x76   : > { %p484_p5 = scmp.lt.s32.totalorder %s482_s7, %s476_s5 }
  0x78   : > { %p485_p10 = por %p484_p5, %p483_p4 }
  0x7a   : > { %p486_p3 = pnand %p485_p10, %p479_p13 }
  0x7c   : > { %489 = shalt.err (!%p486_p3)
}
  0x7d   : > { %s490_s11 = scalar_lea.hbm %s786_s8, 128  ;;  %s494_s9 = scalar_lea.hbm %s845_s3, 256 }
  0x7e   : > { %p491_p0 = scmp.ne.s32.totalorder %s786_s8, %s490_s11  ;;  %p495_p12 = scmp.lt.u32.totalorder %s786_s8, %s845_s3 }
  0x7f   : > { %p496_p1 = scmp.lt.u32.totalorder %s494_s9, %s490_s11  ;;  %p498_p8 = scmp.lt.u32.totalorder %s490_s11, %s786_s8 }
  0x80   : > { %p492_p6 = pnand %p491_p0, %p856_p2 }
  0x81   : > { %p497_p7 = por %p496_p1, %p495_p12 }
  0x82   : > { %p493_p11 = pneg %p492_p6 }
  0x83   : > { %p499_p9 = por %p498_p8, %p497_p7 }
  0x85   : > { %p500_p13 = pnand %p499_p9, %p493_p11 }
  0x87   : > { %503 = shalt.err (!%p500_p13)
}
  0x88   : > { %334 = dma.vmem_to_hbm [thread:$0]  (%p856_p2), %s781_s15, 128, %s786_s8, %s213_s17  }
  0x89 PF: > { %s241_s6 = sand.u32 1, %s552_s1   ;;  %p858_p4 = scmp.ne.s32.totalorder %s852_s16, 0 }
  0x8a   : > { %p859_p5 = scmp.ge.s32.totalorder %s584_s28, 2  ;;  %s242_s18 = scalar_lea.sflag [#allocation7], %s241_s6 }
  0x8c   : > { %p343_p10 = pnand %p859_p5, %p858_p4 }
  0x8e   : > { %547 = dma.done.wait (!%p343_p10), %s242_s18, 128  }
  0x8f   : > { %549 = vsyncadd (!%p343_p10), %s242_s18, 4294967168  ;;  %s29_s28 = sadd.s32 1, %s584_s28   ;;  %s860_s1 = smov %s556_s21 }
  0x90   : > { %p26_p3 = scmp.ge.s32.totalorder %s29_s28, 4   ;;  %s861_s21 = smov %s560_s22 }
  0x91   : > { %s862_s22 = smov %s703_s23  ;;  %s863_s23 = smov %s568_s24 }
  0x92   : > { %s864_s24 = smov %s572_s25  ;;  %s865_s25 = smov %s698_s20 }
  0x93   : > { %s866_s26 = smov %s580_s27  ;;  %s867_s27 = smov %s869_s4 }
  0x94   :  { %28 = sbr.rel (!%p26_p3) target bundleno = 33 (0x21), region = 69 }
  0x9b   :  { %247 = vsyncpa [#allocation6], 1 }
  0x9c   :  { %249 = vsyncpa [#allocation6 + $0x1], 1 }
  0x9d   :  { %250 = vsyncpa [#allocation7], 1 }
  0x9e   :  { %252 = vsyncpa [#allocation7 + $0x1], 1 }

</bundles_post_ra>
